<compile_context>
chip_gen: v7x
topology: tpu7x:2x2x1
jax: 0.10.0
libtpu: 0.0.40
codegen_flags: <defaults>
</compile_context>

<pallas_src>
import functools

import jax
import jax.numpy as jnp
from jax.experimental import pallas as pl
from jax.experimental.pallas import tpu as pltpu


def _ce_loss_kernel(logits_ref, labels_ref, weight_ref, num_ref, den_ref, *,
                    n_total, tile_n, tiles_per_split):
    # logits_ref: (TILE_N, C) native dtype; labels_ref: (TILE_N, 1) int32;
    # weight_ref: (1, C) f32; num_ref/den_ref: (1, 1) f32 accumulators resident
    # across the trailing (reduction) grid axis.
    step = pl.program_id(1)

    @pl.when(step == 0)
    def _init():
        num_ref[...] = jnp.zeros_like(num_ref)
        den_ref[...] = jnp.zeros_like(den_ref)

    logits = logits_ref[...]                                # (TILE_N, C) native dtype
    labels = labels_ref[...]                                # (TILE_N, 1) int32
    weight = weight_ref[...]                                # (1, C) f32

    tn, c = logits.shape

    # One-hot of the target class via a lane-axis iota (no gather).
    class_ids = jax.lax.broadcasted_iota(jnp.int32, (tn, c), 1)
    onehot = class_ids == labels                            # bool (TILE_N, C)

    # w[y_i] and x_i[y_i] per row: one select + one lane reduce (XLU) each.
    w_row = jnp.sum(jnp.where(onehot, weight, 0.0),
                    axis=-1, keepdims=True)                 # (TILE_N, 1) f32
    x_y = jnp.sum(jnp.where(onehot, logits, jnp.zeros([], logits.dtype)),
                  axis=-1, keepdims=True).astype(jnp.float32)

    # Numerically stable log-sum-exp: max/sub in the native dtype, exp/log in f32.
    m = jnp.max(logits, axis=-1, keepdims=True)             # (TILE_N, 1) native
    sumexp = jnp.sum(jnp.exp((logits - m).astype(jnp.float32)),
                     axis=-1, keepdims=True)                # (TILE_N, 1) f32
    lse = m.astype(jnp.float32) + jnp.log(sumexp)

    # Tail-row mask against the true N: rows past the end of the array (partial
    # last tile) may contain garbage logits/labels -> force their contribution
    # (and any NaN produced from garbage) to exactly zero.
    row0 = (pl.program_id(0) * tiles_per_split + step) * tile_n
    row_ids = row0 + jax.lax.broadcasted_iota(jnp.int32, (tn, 1), 0)
    valid = row_ids < n_total

    per_row_num = jnp.where(valid, w_row * (lse - x_y), 0.0)
    per_row_den = jnp.where(valid, w_row, 0.0)

    # NOTE: single f32 scalar accumulator per split; for N >= ~1e7 rows consider
    # a wider per-tile scratch vector if bit-level parity with torch matters.
    num_ref[...] += jnp.sum(per_row_num, axis=0, keepdims=True)
    den_ref[...] += jnp.sum(per_row_den, axis=0, keepdims=True)


def _choose_tile_n(n, c, itemsize):
    # ~2 MiB of logits per tile: double-buffered input tiles plus the f32 exp
    # temp stay under v5e's 16 MiB scoped-VMEM default and well under v7x's
    # 64 MiB physical VMEM, while (per the measured tile sweep) already sitting
    # near the HBM roofline.
    target_bytes = 2 * 1024 * 1024
    rows = max(8, min(n, target_bytes // max(1, c * itemsize)))
    return max(8, (rows // 8) * 8)


@functools.partial(jax.jit, static_argnames=("tile_n",))
def ce_loss(predicted, labels, weight_ce, *, tile_n=None):
    """Weighted cross-entropy loss (mean reduction), matching
    torch.nn.CrossEntropyLoss(weight=weight_ce)(predicted, labels).

    `predicted` may be bf16 or f32; it streams over HBM in its native dtype."""
    n, c = predicted.shape
    itemsize = jnp.dtype(predicted.dtype).itemsize
    if tile_n is None:
        tile_n = _choose_tile_n(n, c, itemsize)
    tile_n = max(8, (int(tile_n) // 8) * 8)

    n_tiles = pl.cdiv(n, tile_n)
    # 2-way split of the reduction only when it divides evenly, so no grid block
    # is ever fully out of range. TODO(synk): CORE_PARALLEL for a real v7x split.
    num_splits = 2 if (n_tiles >= 2 and n_tiles % 2 == 0) else 1
    tiles_per_split = n_tiles // num_splits

    labels2 = labels.astype(jnp.int32).reshape(n, 1)         # cheap: 4 bytes/row
    weight2 = weight_ce.reshape(1, c).astype(jnp.float32)

    kernel = functools.partial(_ce_loss_kernel, n_total=n, tile_n=tile_n,
                               tiles_per_split=tiles_per_split)

    cost = pl.CostEstimate(
        flops=6 * n * c,
        transcendentals=n * c + n,
        bytes_accessed=n * c * itemsize + n * 4 + c * 4 + 2 * num_splits * 4,
    )

    num, den = pl.pallas_call(
        kernel,
        out_shape=(
            jax.ShapeDtypeStruct((num_splits, 1), jnp.float32),
            jax.ShapeDtypeStruct((num_splits, 1), jnp.float32),
        ),
        grid=(num_splits, tiles_per_split),
        in_specs=[
            # logits tile: (TILE_N, C), walks the batch axis (no host pad).
            pl.BlockSpec((tile_n, c), lambda p, i: (p * tiles_per_split + i, 0)),
            # labels tile: (TILE_N, 1)
            pl.BlockSpec((tile_n, 1), lambda p, i: (p * tiles_per_split + i, 0)),
            # per-class weights: constant block index -> DMA'd once, stays resident.
            pl.BlockSpec((1, c), lambda p, i: (0, 0)),
        ],
        out_specs=(
            # per-split partial sums, resident accumulators across the i axis.
            pl.BlockSpec((1, 1), lambda p, i: (p, 0)),
            pl.BlockSpec((1, 1), lambda p, i: (p, 0)),
        ),
        compiler_params=pltpu.CompilerParams(
            dimension_semantics=("parallel", "arbitrary"),
            vmem_limit_bytes=32 * 1024 * 1024,
        ),
        cost_estimate=cost,
    )(predicted, labels2, weight2)

    # Tiny cross-split reduction + the single divide live in XLA.
    # NOTE: den == 0 -> NaN, matching torch.nn.CrossEntropyLoss behaviour.
    return jnp.sum(num) / jnp.sum(den)


def _ce_loss_ref(predicted, labels, weight_ce):
    # pure-JAX reference for verification
    logp = jax.nn.log_softmax(predicted.astype(jnp.float32), axis=-1)
    nll = -jnp.take_along_axis(logp, labels[:, None].astype(jnp.int32), axis=-1)[:, 0]
    w = weight_ce[labels]
    return jnp.sum(w * nll) / jnp.sum(w)


if __name__ == "__main__":
    key = jax.random.PRNGKey(0)
    k1, k2, k3, k4, k5, k6, k7 = jax.random.split(key, 7)

    # --- test 1: small shapes matching the module's forward: (N, C) logits + N labels ---
    N, C = 8, 16
    predicted = jax.random.normal(k1, (N, C), dtype=jnp.float32)
    labels = jax.random.randint(k2, (N,), 0, C, dtype=jnp.int32)
    weight_CE = jax.random.uniform(k3, (C,), dtype=jnp.float32, minval=0.5, maxval=1.5)

    loss = jax.block_until_ready(ce_loss(predicted, labels, weight_CE))
    ref = jax.block_until_ready(_ce_loss_ref(predicted, labels, weight_CE))
    assert jnp.allclose(loss, ref, rtol=1e-5, atol=1e-5), (loss, ref)

    # --- test 2: N not a tile multiple -> exercises the in-kernel tail-row mask (no pad) ---
    N2 = 37
    predicted2 = jax.random.normal(k4, (N2, C), dtype=jnp.float32)
    labels2 = jax.random.randint(k5, (N2,), 0, C, dtype=jnp.int32)

    loss2 = jax.block_until_ready(ce_loss(predicted2, labels2, weight_CE, tile_n=8))
    ref2 = jax.block_until_ready(_ce_loss_ref(predicted2, labels2, weight_CE))
    assert jnp.allclose(loss2, ref2, rtol=1e-5, atol=1e-5), (loss2, ref2)

    # --- test 3: bf16 logits + even tile count -> native-dtype streaming + 2-way split ---
    N3 = 64
    predicted3 = jax.random.normal(k6, (N3, C), dtype=jnp.bfloat16)
    labels3 = jax.random.randint(k7, (N3,), 0, C, dtype=jnp.int32)

    loss3 = jax.block_until_ready(ce_loss(predicted3, labels3, weight_CE, tile_n=8))
    ref3 = jax.block_until_ready(_ce_loss_ref(predicted3, labels3, weight_CE))
    assert jnp.allclose(loss3, ref3, rtol=2e-2, atol=2e-2), (loss3, ref3)

    print("KERNEL_OK")
</pallas_src>

<mosaic_0001>
module attributes {stable_mosaic.version = 11 : i64} {
  func.func @_ce_loss_kernel(%arg0: i32, %arg1: i32, %arg2: memref<8x16xf32, #tpu.memory_space<vmem>>, %arg3: memref<8x1xi32, #tpu.memory_space<vmem>>, %arg4: memref<1x16xf32, #tpu.memory_space<vmem>>, %arg5: memref<1x1xf32, #tpu.memory_space<vmem>>, %arg6: memref<1x1xf32, #tpu.memory_space<vmem>>) attributes {dimension_semantics = [#tpu.dimension_semantics<parallel>, #tpu.dimension_semantics<arbitrary>], iteration_bounds = array<i64: 1, 1>, scalar_prefetch = 0 : i64, scratch_operands = 0 : i64, tpu.core_type = #tpu.core_type<tc>, window_params = [{transform_indices = @transform_0, window_bounds = array<i64: 8, 16>}, {transform_indices = @transform_1, window_bounds = array<i64: 8, 1>}, {pipeline_mode = #tpu.pipeline_mode<synchronous>, transform_indices = @transform_2, window_bounds = array<i64: 1, 16>}, {transform_indices = @transform_3, window_bounds = array<i64: 1, 1>}, {transform_indices = @transform_4, window_bounds = array<i64: 1, 1>}]} {
    %c0_i32 = arith.constant 0 : i32
    %0 = arith.cmpi eq, %arg1, %c0_i32 : i32
    %1 = arith.extui %0 : i1 to i32
    %c0_i32_0 = arith.constant 0 : i32
    %2 = arith.cmpi ne, %1, %c0_i32_0 : i32
    scf.if %2 {
      %cst_24 = arith.constant 0.000000e+00 : f32
      %52 = vector.broadcast %cst_24 : f32 to vector<1x1xf32>
      %c0_25 = arith.constant 0 : index
      %c0_26 = arith.constant 0 : index
      %53 = vector.load %arg5[%c0_25, %c0_26] : memref<1x1xf32, #tpu.memory_space<vmem>>, vector<1x1xf32>
      tpu.vector_store %arg5[%c0_25, %c0_26], %52 {strides = array<i32>} : memref<1x1xf32, #tpu.memory_space<vmem>>, vector<1x1xf32>,
      %cst_27 = arith.constant 0.000000e+00 : f32
      %54 = vector.broadcast %cst_27 : f32 to vector<1x1xf32>
      %c0_28 = arith.constant 0 : index
      %c0_29 = arith.constant 0 : index
      %55 = vector.load %arg6[%c0_28, %c0_29] : memref<1x1xf32, #tpu.memory_space<vmem>>, vector<1x1xf32>
      tpu.vector_store %arg6[%c0_28, %c0_29], %54 {strides = array<i32>} : memref<1x1xf32, #tpu.memory_space<vmem>>, vector<1x1xf32>,
    } else {
    }
    %c0 = arith.constant 0 : index
    %c0_1 = arith.constant 0 : index
    %3 = vector.load %arg2[%c0, %c0_1] : memref<8x16xf32, #tpu.memory_space<vmem>>, vector<8x16xf32>
    %c0_2 = arith.constant 0 : index
    %c0_3 = arith.constant 0 : index
    %4 = vector.load %arg3[%c0_2, %c0_3] : memref<8x1xi32, #tpu.memory_space<vmem>>, vector<8x1xi32>
    %c0_4 = arith.constant 0 : index
    %c0_5 = arith.constant 0 : index
    %5 = vector.load %arg4[%c0_4, %c0_5] : memref<1x16xf32, #tpu.memory_space<vmem>>, vector<1x16xf32>
    %6 = tpu.iota {dimensions = array<i32: 1>} : vector<8x16xi32>
    %7 = vector.broadcast %4 : vector<8x1xi32> to vector<8x16xi32>
    %8 = arith.cmpi eq, %6, %7 : vector<8x16xi32>
    %cst = arith.constant 0.000000e+00 : f32
    %9 = vector.shape_cast %5 : vector<1x16xf32> to vector<1x16xf32>
    %10 = vector.broadcast %9 : vector<1x16xf32> to vector<8x16xf32>
    %11 = vector.broadcast %cst : f32 to vector<8x16xf32>
    %12 = arith.select %8, %10, %11 : vector<8x16xi1>, vector<8x16xf32>
    %cst_6 = arith.constant dense<0.000000e+00> : vector<8xf32>
    %13 = vector.multi_reduction <add>, %12, %cst_6 [1] : vector<8x16xf32> to vector<8xf32>
    %14 = vector.shape_cast %13 : vector<8xf32> to vector<8x1xf32>
    %cst_7 = arith.constant 0.000000e+00 : f32
    %15 = vector.broadcast %cst_7 : f32 to vector<8x16xf32>
    %16 = arith.select %8, %3, %15 : vector<8x16xi1>, vector<8x16xf32>
    %cst_8 = arith.constant dense<0.000000e+00> : vector<8xf32>
    %17 = vector.multi_reduction <add>, %16, %cst_8 [1] : vector<8x16xf32> to vector<8xf32>
    %18 = vector.shape_cast %17 : vector<8xf32> to vector<8x1xf32>
    %cst_9 = arith.constant dense<0xFF800000> : vector<8xf32>
    %19 = vector.multi_reduction <maximumf>, %3, %cst_9 [1] : vector<8x16xf32> to vector<8xf32>
    %20 = vector.shape_cast %19 : vector<8xf32> to vector<8x1xf32>
    %21 = vector.broadcast %20 : vector<8x1xf32> to vector<8x16xf32>
    %22 = arith.subf %3, %21 : vector<8x16xf32>
    %23 = math.exp %22 : vector<8x16xf32>
    %cst_10 = arith.constant dense<0.000000e+00> : vector<8xf32>
    %24 = vector.multi_reduction <add>, %23, %cst_10 [1] : vector<8x16xf32> to vector<8xf32>
    %25 = vector.shape_cast %24 : vector<8xf32> to vector<8x1xf32>
    %26 = math.log %25 : vector<8x1xf32>
    %27 = arith.addf %20, %26 : vector<8x1xf32>
    %c1_i32 = arith.constant 1 : i32
    %28 = arith.muli %arg0, %c1_i32 : i32
    %29 = arith.addi %28, %arg1 : i32
    %c8_i32 = arith.constant 8 : i32
    %30 = arith.muli %29, %c8_i32 : i32
    %31 = tpu.iota {dimensions = array<i32: 0>} : vector<8x1xi32>
    %32 = vector.broadcast %30 : i32 to vector<8x1xi32>
    %33 = arith.addi %32, %31 : vector<8x1xi32>
    %c8_i32_11 = arith.constant 8 : i32
    %34 = vector.broadcast %c8_i32_11 : i32 to vector<8x1xi32>
    %35 = arith.cmpi slt, %33, %34 : vector<8x1xi32>
    %36 = arith.subf %27, %18 : vector<8x1xf32>
    %37 = arith.mulf %14, %36 : vector<8x1xf32>
    %cst_12 = arith.constant 0.000000e+00 : f32
    %38 = vector.broadcast %cst_12 : f32 to vector<8x1xf32>
    %39 = arith.select %35, %37, %38 : vector<8x1xi1>, vector<8x1xf32>
    %cst_13 = arith.constant 0.000000e+00 : f32
    %40 = vector.broadcast %cst_13 : f32 to vector<8x1xf32>
    %41 = arith.select %35, %14, %40 : vector<8x1xi1>, vector<8x1xf32>
    %c0_14 = arith.constant 0 : index
    %c0_15 = arith.constant 0 : index
    %42 = vector.load %arg5[%c0_14, %c0_15] : memref<1x1xf32, #tpu.memory_space<vmem>>, vector<1x1xf32>
    %cst_16 = arith.constant dense<0.000000e+00> : vector<1xf32>
    %43 = vector.multi_reduction <add>, %39, %cst_16 [0] : vector<8x1xf32> to vector<1xf32>
    %44 = vector.shape_cast %43 : vector<1xf32> to vector<1x1xf32>
    %45 = arith.addf %42, %44 : vector<1x1xf32>
    %c0_17 = arith.constant 0 : index
    %c0_18 = arith.constant 0 : index
    %46 = vector.load %arg5[%c0_17, %c0_18] : memref<1x1xf32, #tpu.memory_space<vmem>>, vector<1x1xf32>
    tpu.vector_store %arg5[%c0_17, %c0_18], %45 {strides = array<i32>} : memref<1x1xf32, #tpu.memory_space<vmem>>, vector<1x1xf32>,
    %c0_19 = arith.constant 0 : index
    %c0_20 = arith.constant 0 : index
    %47 = vector.load %arg6[%c0_19, %c0_20] : memref<1x1xf32, #tpu.memory_space<vmem>>, vector<1x1xf32>
    %cst_21 = arith.constant dense<0.000000e+00> : vector<1xf32>
    %48 = vector.multi_reduction <add>, %41, %cst_21 [0] : vector<8x1xf32> to vector<1xf32>
    %49 = vector.shape_cast %48 : vector<1xf32> to vector<1x1xf32>
    %50 = arith.addf %47, %49 : vector<1x1xf32>
    %c0_22 = arith.constant 0 : index
    %c0_23 = arith.constant 0 : index
    %51 = vector.load %arg6[%c0_22, %c0_23] : memref<1x1xf32, #tpu.memory_space<vmem>>, vector<1x1xf32>
    tpu.vector_store %arg6[%c0_22, %c0_23], %50 {strides = array<i32>} : memref<1x1xf32, #tpu.memory_space<vmem>>, vector<1x1xf32>,
    return
  }
  func.func @transform_0(%arg0: i32, %arg1: i32) -> (i32, i32) {
    %c1_i32 = arith.constant 1 : i32
    %0 = arith.muli %arg0, %c1_i32 : i32
    %1 = arith.addi %0, %arg1 : i32
    %c0_i32 = arith.constant 0 : i32
    %c0_i32_0 = arith.constant 0 : i32
    return %1, %c0_i32 : i32, i32
  }
  func.func @transform_1(%arg0: i32, %arg1: i32) -> (i32, i32) {
    %c1_i32 = arith.constant 1 : i32
    %0 = arith.muli %arg0, %c1_i32 : i32
    %1 = arith.addi %0, %arg1 : i32
    %c0_i32 = arith.constant 0 : i32
    %c0_i32_0 = arith.constant 0 : i32
    return %1, %c0_i32 : i32, i32
  }
  func.func @transform_2(%arg0: i32, %arg1: i32) -> (i32, i32) {
    %c0_i32 = arith.constant 0 : i32
    %c0_i32_0 = arith.constant 0 : i32
    %c0_i32_1 = arith.constant 0 : i32
    return %c0_i32, %c0_i32_0 : i32, i32
  }
  func.func @transform_3(%arg0: i32, %arg1: i32) -> (i32, i32) {
    %c0_i32 = arith.constant 0 : i32
    %c0_i32_0 = arith.constant 0 : i32
    return %arg0, %c0_i32 : i32, i32
  }
  func.func @transform_4(%arg0: i32, %arg1: i32) -> (i32, i32) {
    %c0_i32 = arith.constant 0 : i32
    %c0_i32_0 = arith.constant 0 : i32
    return %arg0, %c0_i32 : i32, i32
  }
}

</mosaic_0001>

<bundles_post_ra>
// kernel: ce_loss.1
= control target key start
LH: loop header
LB: loop body
LE: loop exit
PB: predicated region body
PF: predicated region fallthrough
CT: control target
= control target key end

     0   :  { %10 = vsyncpa [#allocation3], 0  ;;  %vm75_vm0 = vcmask 130048   ;;  %s293_s0 = inlined_call_operand.vmem [shape: f32[8,16], index: 0, kind: input, shape index: {}]   ;;  %s294_s1 = inlined_call_operand.vmem [shape: s32[8,1], index: 1, kind: input, shape index: {}]   ;;  %s295_s2 = inlined_call_operand.vmem [shape: f32[1,16], index: 2, kind: input, shape index: {}]   ;;  %s296_s3 = inlined_call_operand.hbm [shape: f32[1,1], index: 3, kind: output, shape index: {0}]   ;;  %s297_s4 = inlined_call_operand.hbm [shape: f32[1,1], index: 4, kind: output, shape index: {1}]  }
   0x1   :  { %v59_v0 = vld [vmem:[%s293_s0] sm:$0xff] }
   0x2   :  { %11 = vsyncpa [#allocation5], 0  ;;  %v83_v1 = vsel %vm75_vm0, %v59_v0, -inf  ;;  %v223_v2 = vmov 0   ;;  %v60_v3 = vld [vmem:[%s294_s1] sm:$0xff]  ;;  %v62_v7 = vlaneseq  ;;  %vm56_vm2 = vcmask 0  }
   0x3   :  { %170 = vset.pattern.permute.xlu0 %v223_v2  ;;  %v165_v13 = vld [vmem:[%s295_s2] ss:$0 sm:$0xff]  ;;  %v224_v17 = vmov 0.0   ;;  %s225_s1 = smov [#allocation4]  }
   0x4   :  { %84 = vmax.xlane.f32.xlu0 %v83_v1  ;;  %v63_v8 = vand.u32 127, %v62_v7  ;;  %57 = vst.msk [vmem:[#allocation2] sm:$0x1] %vm56_vm2, %v224_v17  ;;  %58 = vst.msk [vmem:[#allocation4] sm:$0x1] %vm56_vm2, %v224_v17  ;;  %s141_s2 = sshll.u32 %s225_s1, 4  ;;  %s142_s2 = int_to_ptr.vmem [resolvable:$true] %s141_s2 }
   0x5   :  { %s175_s20 = scalar_lea.vmem %s142_s2, 16  ;;  %s179_s21 = scalar_lea.vmem %s142_s2, 32 }
   0x6   :  { %p176_p0 = scmp.ne.s32.totalorder %s142_s2, %s175_s20  ;;  %p180_p1 = scmp.lt.s32.totalorder %s142_s2, %s142_s2 }
   0x7   :  { %p181_p2 = scmp.lt.s32.totalorder %s179_s21, %s175_s20 }
   0x9   :  { %p182_p3 = por %p181_p2, %p180_p1 }
   0xb   :  { %v116_v31 = vld [vmem:[#allocation4] sm:$0x1]  ;;  %p183_p4 = pnand %p182_p3, %p176_p0 }
  0x1a   :  { %65 = vperm.xlu0 %170, %v60_v3  }
  0x91   :  { %v85_v4 = vpop.xlane.xlu0 %84 }
  0x92   :  { %v86_v5 = vsub.f32 %v59_v0, %v85_v4 }
  0x94   :  { %v87_v6 = vmul.f32 1.442695, %v86_v5 }
  0x96   :  { %171 = vpow2.f32 %v87_v6 }
  0x99   :  { %v66_v9 = vpop.permute.xlu0 %65 }
  0x9a   :  { %vm67_vm1 = vcmp.eq.s32.totalorder %v63_v8, %v66_v9 }
  0x9b   :  { %v79_v11 = vsel %vm67_vm1, %v59_v0, 0.0  ;;  %v74_v15 = vsel %vm67_vm1, %v165_v13, 0.0 }
  0x9c   :  { %v80_v14 = vsel %vm75_vm0, %v79_v11, 0.0  ;;  %v76_v16 = vsel %vm75_vm0, %v74_v15, 0.0 }
  0xa0   :  { %v172_v10 = vpop.eup %171 }
  0xa1   :  { %v89_v12 = vsel %vm75_vm0, %v172_v10, 0.0 }
  0xa2   :  { %90 = vadd.xlane.f32.xlu1 %v89_v12 }
  0xa6   :  { %81 = vadd.xlane.f32.xlu1 %v80_v14 }
  0xaa   :  { %77 = vadd.xlane.f32.xlu1 %v76_v16 }
 0x12f   :  { %v91_v18 = vpop.xlane.xlu1 %90 }
 0x130   :  { %173 = vlog2.f32 %v91_v18 }
 0x133   :  { %v82_v19 = vpop.xlane.xlu1 %81 }
 0x137   :  { %v78_v20 = vpop.xlane.xlu1 %77 }
 0x138   :  { %v117_v21 = vrot.slane %v78_v20, 4 }
 0x13a   :  { %v174_v22 = vpop.eup %173  ;;  %v118_v23 = vadd.f32 %v117_v21, %v78_v20 }
 0x13b   :  { %v93_v24 = vmul.f32 0.6931472, %v174_v22 }
 0x13c   :  { %v119_v25 = vrot.slane %v118_v23, 2 }
 0x13d   :  { %v94_v26 = vadd.f32 %v93_v24, %v85_v4 }
 0x13e   :  { %v120_v27 = vadd.f32 %v119_v25, %v118_v23 }
 0x13f   :  { %v102_v28 = vsub.f32 %v94_v26, %v82_v19 }
 0x140   :  { %v121_v29 = vrot.slane %v120_v27, 1 }
 0x141   :  { %v103_v30 = vmul.f32 %v102_v28, %v78_v20 }
 0x142   :  { %v122_v32 = vadd.f32 %v121_v29, %v120_v27 }
 0x143   :  { %v107_v33 = vrot.slane %v103_v30, 4 }
 0x144   :  { %v123_v34 = vadd.f32 %v122_v32, %v116_v31 }
 0x145   :  { %v108_v35 = vadd.f32 %v107_v33, %v103_v30 }
 0x146   :  { %124 = vst.msk [vmem:[#allocation4] sm:$0x1] %vm56_vm2, %v123_v34 }
 0x147   :  { %v109_v36 = vrot.slane %v108_v35, 2 }
 0x148   :  { %186 = shalt.err (!%p183_p4)
}
 0x149   :  { %s187_s24 = scalar_lea.hbm %s297_s4, 16 }
 0x14a   :  { %p188_p5 = scmp.ne.s32.totalorder %s297_s4, %s187_s24  ;;  %p191_p6 = scmp.lt.u32.totalorder %s187_s24, %s297_s4 }
 0x14c   :  { %p193_p7 = pnand %p191_p6, %p188_p5 }
 0x14e   :  { %196 = shalt.err (!%p193_p7)
}
 0x14f   :  { %144 = dma.vmem_to_hbm [thread:$0]  %s142_s2, 16, %s297_s4, [#allocation5]   ;;  %v110_v37 = vadd.f32 %v109_v36, %v108_v35  ;;  %v106_v39 = vld [vmem:[#allocation2] sm:$0x1] }
 0x150   :  { %s226_s5 = smov [#allocation2]  }
 0x151   :  { %v111_v38 = vrot.slane %v110_v37, 1  ;;  %s131_s6 = sshll.u32 %s226_s5, 4  ;;  %s132_s6 = int_to_ptr.vmem [resolvable:$true] %s131_s6 }
 0x152   :  { %s197_s7 = scalar_lea.vmem %s132_s6, 16  ;;  %s201_s8 = scalar_lea.vmem %s132_s6, 32 }
 0x153   :  { %v112_v40 = vadd.f32 %v111_v38, %v110_v37  ;;  %p198_p8 = scmp.ne.s32.totalorder %s132_s6, %s197_s7  ;;  %p202_p9 = scmp.lt.s32.totalorder %s132_s6, %s132_s6 }
 0x154   :  { %p203_p10 = scmp.lt.s32.totalorder %s201_s8, %s197_s7 }
 0x155   :  { %v113_v41 = vadd.f32 %v112_v40, %v106_v39 }
 0x156   :  { %p204_p11 = por %p203_p10, %p202_p9 }
 0x157   :  { %115 = vst.msk [vmem:[#allocation2] sm:$0x1] %vm56_vm2, %v113_v41 }
 0x158   :  { %p205_p12 = pnand %p204_p11, %p198_p8 }
 0x15a   :  { %208 = shalt.err (!%p205_p12)
}
 0x15b   :  { %s209_s10 = scalar_lea.hbm %s296_s3, 16 }
 0x15c   :  { %p210_p13 = scmp.ne.s32.totalorder %s296_s3, %s209_s10  ;;  %p213_p0 = scmp.lt.u32.totalorder %s209_s10, %s296_s3 }
 0x15e   :  { %p215_p1 = pnand %p213_p0, %p210_p13 }
 0x160   :  { %218 = shalt.err (!%p215_p1)
}
 0x161   :  { %134 = dma.vmem_to_hbm [thread:$0]  %s132_s6, 16, %s296_s3, [#allocation3]  }
 0x162   :  { %219 = dma.done.wait [#allocation3], 16  }
 0x163   :  { %220 = vsyncadd [#allocation3], 4294967280 }
 0x164   :  { %221 = dma.done.wait [#allocation5], 16  }
 0x165   :  { %222 = vsyncadd [#allocation5], 4294967280 }
 0x166   :  { %151 = vsyncpa [#allocation3], 1 }
 0x167   :  { %152 = vsyncpa [#allocation5], 1 }

</bundles_post_ra>
